<compile_context>
chip_gen: v7x
topology: tpu7x:2x2x1
jax: 0.10.0
libtpu: 0.0.40
codegen_flags: <defaults>
</compile_context>

<pallas_src>
import jax
import jax.numpy as jnp
from jax.experimental import pallas as pl
from jax.experimental.pallas import tpu as pltpu


_ROW_CAP = 256                    # max rows (sublane axis) per tile
_HW_CAP = 4096                    # max lanes per tile: 256x4096 f32 = 4 MiB of x
_MIN_PALLAS_BYTES = 64 * 1024     # below this, XLA's fused affine wins
_VMEM_LIMIT = 48 * 1024 * 1024    # covers v5e's 16 MiB default; < v7x 64 MiB phys


# ----------------------------- kernels --------------------------------------


def modulate_kernel(scale_ref, shift_ref, x_ref, o_ref):
    """out = x * scale + shift (row broadcast). scale/shift: (row_tile, 1) f32."""
    xv = x_ref[...].astype(jnp.float32)                 # single upcast per tile
    o_ref[...] = (xv * scale_ref[...] + shift_ref[...]).astype(o_ref.dtype)


def modulate_folded_kernel(scale_ref, shift_ref, e_ref, x_ref, o_ref):
    """Small-H*W path: k rows folded into the lane axis.

    scale/shift: (row_tile, k) f32; e: (k, k*HW) one-hot expansion matrix;
    x/o: (row_tile, k*HW).  The expansion matmul runs on the otherwise-idle
    MXU, keeping the output store lane-dense (no vst.msk).
    """
    scale = jnp.dot(scale_ref[...], e_ref[...], preferred_element_type=jnp.float32)
    shift = jnp.dot(shift_ref[...], e_ref[...], preferred_element_type=jnp.float32)
    xv = x_ref[...].astype(jnp.float32)
    o_ref[...] = (xv * scale + shift).astype(o_ref.dtype)


# --------------------------- tiling helpers ---------------------------------


def _sublane_align(dtype):
    # Sub-32-bit dtypes pack 2/4 rows per sublane; keep packed rows together.
    return {4: 8, 2: 16, 1: 32}.get(jnp.dtype(dtype).itemsize, 8)


def _round_up(v, m):
    return (v + m - 1) // m * m


def _pick_row_tile(rows, sub):
    if rows <= sub:
        return rows                                  # full extent (always legal)
    if rows <= _ROW_CAP:
        return rows if rows % sub == 0 else (rows // sub) * sub
    return _ROW_CAP


def _pick_hw_tile(hw):
    # hw >= 128 here; tiles are multiples of 128 and never larger than hw.
    if hw <= _HW_CAP:
        return hw if hw % 128 == 0 else (hw // 128) * 128
    return _HW_CAP


# ----------------------------- wrappers -------------------------------------


def _modulate_2d(x2d, scale, shift, sub, out_dtype):
    rows, HW = x2d.shape
    row_tile = _pick_row_tile(rows, sub)
    hw_tile = _pick_hw_tile(HW)
    # v7x megacore: ensure a parallel axis has >= 2 steps when splittable.
    if pl.cdiv(rows, row_tile) == 1 and pl.cdiv(HW, hw_tile) == 1:
        if HW > 128:
            hw_tile = _round_up(pl.cdiv(HW, 2), 128)
        elif rows > sub:
            row_tile = _round_up(pl.cdiv(rows, 2), sub)
    grid = (pl.cdiv(rows, row_tile), pl.cdiv(HW, hw_tile))

    return pl.pallas_call(
        modulate_kernel,
        out_shape=jax.ShapeDtypeStruct((rows, HW), out_dtype),
        grid_spec=pltpu.PrefetchScalarGridSpec(
            num_scalar_prefetch=0,
            grid=grid,
            in_specs=[
                pl.BlockSpec((row_tile, 1), lambda r, s: (r, 0)),        # scale
                pl.BlockSpec((row_tile, 1), lambda r, s: (r, 0)),        # shift
                pl.BlockSpec((row_tile, hw_tile), lambda r, s: (r, s)),  # x
            ],
            out_specs=pl.BlockSpec((row_tile, hw_tile), lambda r, s: (r, s)),
        ),
        compiler_params=pltpu.CompilerParams(
            dimension_semantics=("parallel", "parallel"),
            vmem_limit_bytes=_VMEM_LIMIT),
    )(scale, shift, x2d)


def _modulate_folded(x2d, scale, shift, k, sub, out_dtype):
    rows, HW = x2d.shape
    rows2 = rows // k
    lanes = k * HW                                   # multiple of 128 by construction
    xf = x2d.reshape(rows2, lanes)
    scale_k = scale.reshape(rows2, k)
    shift_k = shift.reshape(rows2, k)
    # One-hot expansion: expanded[r, l] = scale_k[r, l // HW].
    e = (jnp.arange(lanes, dtype=jnp.int32) // HW ==
         jnp.arange(k, dtype=jnp.int32)[:, None]).astype(jnp.float32)    # (k, lanes)

    row_tile = _pick_row_tile(rows2, sub)
    if pl.cdiv(rows2, row_tile) == 1 and rows2 > sub:
        row_tile = _round_up(pl.cdiv(rows2, 2), sub)
    grid = (pl.cdiv(rows2, row_tile),)

    out = pl.pallas_call(
        modulate_folded_kernel,
        out_shape=jax.ShapeDtypeStruct((rows2, lanes), out_dtype),
        grid_spec=pltpu.PrefetchScalarGridSpec(
            num_scalar_prefetch=0,
            grid=grid,
            in_specs=[
                pl.BlockSpec((row_tile, k), lambda r: (r, 0)),       # scale
                pl.BlockSpec((row_tile, k), lambda r: (r, 0)),       # shift
                pl.BlockSpec((k, lanes), lambda r: (0, 0)),          # expansion
                pl.BlockSpec((row_tile, lanes), lambda r: (r, 0)),   # x
            ],
            out_specs=pl.BlockSpec((row_tile, lanes), lambda r: (r, 0)),
        ),
        compiler_params=pltpu.CompilerParams(
            dimension_semantics=("parallel",),
            vmem_limit_bytes=_VMEM_LIMIT),
    )(scale_k, shift_k, e, xf)
    return out.reshape(rows, HW)


def apply_style(x, latent, weight, bias, *, w_lrmul=1.0, b_lrmul=1.0,
                force_pallas=False):
    """x: [B, C, H, W] (NCHW), latent: [B, L], weight: [2C, L], bias: [2C]."""
    B, C, H, W = x.shape
    HW = H * W
    rows = B * C
    out_dtype = x.dtype

    # ---- Style FC hoisted out of the grid: one matmul via XLA (MXU). ----
    w = weight.astype(jnp.float32) * w_lrmul                  # (2C, L)
    b = bias.astype(jnp.float32) * b_lrmul                    # (2C,)
    z = jnp.dot(latent.astype(jnp.float32), w.T) + b          # (B, 2C)
    style = jnp.where(z > 0, z, 0.2 * z)                      # leaky_relu(0.2)
    scale = (style[:, :C] + 1.0).reshape(rows, 1)             # (B*C, 1) f32, +1 folded
    shift = style[:, C:].reshape(rows, 1)                     # (B*C, 1) f32

    x2d = x.reshape(rows, HW)
    sub = _sublane_align(out_dtype)

    # Tiny tensors: the ~0.35us/step Pallas overhead dominates -> let XLA fuse.
    if not force_pallas and x.size * x.dtype.itemsize < _MIN_PALLAS_BYTES:
        out = (x2d.astype(jnp.float32) * scale + shift).astype(out_dtype)
        return out.reshape(B, C, H, W)

    if HW >= 128:
        out = _modulate_2d(x2d, scale, shift, sub, out_dtype)
    else:
        k = 128 // HW if 128 % HW == 0 else 0
        if k:
            while k * HW < 512 and rows % (2 * k) == 0:
                k *= 2                                # widen the folded lane axis
        if k and rows % k == 0:
            out = _modulate_folded(x2d, scale, shift, k, sub, out_dtype)
        else:
            # TODO(synk): H*W < 128 and not cleanly foldable into 128 lanes ->
            # masked stores would dominate; use XLA's fused affine instead.
            out = (x2d.astype(jnp.float32) * scale + shift).astype(out_dtype)

    return out.reshape(B, C, H, W)


# ----------------------------- reference ------------------------------------


def apply_style_ref(x, latent, weight, bias, *, w_lrmul=1.0, b_lrmul=1.0):
    """Pure-JAX reference mirroring the PyTorch forward."""
    z = latent.astype(jnp.float32) @ (weight.astype(jnp.float32) * w_lrmul).T \
        + bias.astype(jnp.float32) * b_lrmul
    style = jnp.where(z > 0, z, 0.2 * z)                      # leaky_relu(0.2)
    B, C = x.shape[0], x.shape[1]
    style = style.reshape(B, 2, C, 1, 1)
    out = x.astype(jnp.float32) * (style[:, 0] + 1.0) + style[:, 1]
    return out.astype(x.dtype)


def _run_case(key, B, C, H, W, latent_size, dtype=jnp.float32,
              force_pallas=False, atol=1e-5, rtol=1e-5):
    kx, kl, kw = jax.random.split(key, 3)
    x = jax.random.normal(kx, (B, C, H, W), dtype=jnp.float32).astype(dtype)
    latent = jax.random.normal(kl, (B, latent_size), dtype=jnp.float32)

    # FC init: gain=1.0, use_wscale=False, lrmul=1.0
    he_std = 1.0 * latent_size ** (-0.5)
    weight = jax.random.normal(kw, (2 * C, latent_size), dtype=jnp.float32) * he_std
    bias = jnp.zeros((2 * C,), dtype=jnp.float32)

    out = apply_style(x, latent, weight, bias, w_lrmul=1.0, b_lrmul=1.0,
                      force_pallas=force_pallas)
    out = jax.block_until_ready(out)
    ref = apply_style_ref(x, latent, weight, bias, w_lrmul=1.0, b_lrmul=1.0)
    assert out.shape == (B, C, H, W)
    assert out.dtype == x.dtype
    assert jnp.allclose(out.astype(jnp.float32), ref.astype(jnp.float32),
                        atol=atol, rtol=rtol), f"mismatch: {(B, C, H, W, dtype)}"


if __name__ == "__main__":
    key = jax.random.PRNGKey(0)
    k1, k2, k3, k4, k5 = jax.random.split(key, 5)

    # Module-scale small case (B=2, C=4, 16x16, latent=32): forced through the
    # Pallas path; the >=2-step split gives grid (1, 2) with 128-lane tiles.
    _run_case(k1, B=2, C=4, H=16, W=16, latent_size=32, force_pallas=True)

    # Larger aligned case: (16, 4096) f32 -> grid (1, 2), 2048-lane tiles.
    _run_case(k2, B=2, C=8, H=64, W=64, latent_size=32)

    # Unaligned case exercising cdiv-padded tail blocks on both axes
    # (rows=15, HW=400 -> 8x384 tiles, grid (2, 2)).
    _run_case(k3, B=3, C=5, H=20, W=20, latent_size=32, force_pallas=True)

    # Small-feature-map case exercising the channel->lane fold
    # (HW=64 < 128 -> fold k=8, 512 lanes, 1-D grid of 2).
    _run_case(k4, B=2, C=64, H=8, W=8, latent_size=32, force_pallas=True)

    # bf16 case: halves HBM traffic; f32 math inside the kernel.
    _run_case(k5, B=2, C=8, H=64, W=64, latent_size=32, dtype=jnp.bfloat16,
              atol=5e-2, rtol=2e-2)

    print("KERNEL_OK")
</pallas_src>

<mosaic_0001>
module attributes {stable_mosaic.version = 11 : i64} {
  func.func @modulate_kernel(%arg0: i32, %arg1: i32, %arg2: memref<8x1xf32, #tpu.memory_space<vmem>>, %arg3: memref<8x1xf32, #tpu.memory_space<vmem>>, %arg4: memref<8x128xf32, #tpu.memory_space<vmem>>, %arg5: memref<8x128xf32, #tpu.memory_space<vmem>>) attributes {dimension_semantics = [#tpu.dimension_semantics<parallel>, #tpu.dimension_semantics<parallel>], iteration_bounds = array<i64: 1, 2>, scalar_prefetch = 0 : i64, scratch_operands = 0 : i64, tpu.core_type = #tpu.core_type<tc>, window_params = [{transform_indices = @transform_0, window_bounds = array<i64: 8, 1>}, {transform_indices = @transform_1, window_bounds = array<i64: 8, 1>}, {transform_indices = @transform_2, window_bounds = array<i64: 8, 128>}, {transform_indices = @transform_3, window_bounds = array<i64: 8, 128>}]} {
    %c0 = arith.constant 0 : index
    %c0_0 = arith.constant 0 : index
    %0 = vector.load %arg4[%c0, %c0_0] : memref<8x128xf32, #tpu.memory_space<vmem>>, vector<8x128xf32>
    %c0_1 = arith.constant 0 : index
    %c0_2 = arith.constant 0 : index
    %1 = vector.load %arg2[%c0_1, %c0_2] : memref<8x1xf32, #tpu.memory_space<vmem>>, vector<8x1xf32>
    %2 = vector.broadcast %1 : vector<8x1xf32> to vector<8x128xf32>
    %3 = arith.mulf %0, %2 : vector<8x128xf32>
    %c0_3 = arith.constant 0 : index
    %c0_4 = arith.constant 0 : index
    %4 = vector.load %arg3[%c0_3, %c0_4] : memref<8x1xf32, #tpu.memory_space<vmem>>, vector<8x1xf32>
    %5 = vector.broadcast %4 : vector<8x1xf32> to vector<8x128xf32>
    %6 = arith.addf %3, %5 : vector<8x128xf32>
    %c0_5 = arith.constant 0 : index
    %c0_6 = arith.constant 0 : index
    %7 = vector.load %arg5[%c0_5, %c0_6] : memref<8x128xf32, #tpu.memory_space<vmem>>, vector<8x128xf32>
    tpu.vector_store %arg5[%c0_5, %c0_6], %6 {strides = array<i32>} : memref<8x128xf32, #tpu.memory_space<vmem>>, vector<8x128xf32>,
    return
  }
  func.func @transform_0(%arg0: i32, %arg1: i32) -> (i32, i32) {
    %c0_i32 = arith.constant 0 : i32
    %c0_i32_0 = arith.constant 0 : i32
    return %arg0, %c0_i32 : i32, i32
  }
  func.func @transform_1(%arg0: i32, %arg1: i32) -> (i32, i32) {
    %c0_i32 = arith.constant 0 : i32
    %c0_i32_0 = arith.constant 0 : i32
    return %arg0, %c0_i32 : i32, i32
  }
  func.func @transform_2(%arg0: i32, %arg1: i32) -> (i32, i32) {
    %c0_i32 = arith.constant 0 : i32
    return %arg0, %arg1 : i32, i32
  }
  func.func @transform_3(%arg0: i32, %arg1: i32) -> (i32, i32) {
    %c0_i32 = arith.constant 0 : i32
    return %arg0, %arg1 : i32, i32
  }
}

</mosaic_0001>

<bundles_post_ra>
// kernel: tpu_custom_call.1
= control target key start
LH: loop header
LB: loop body
LE: loop exit
PB: predicated region body
PF: predicated region fallthrough
CT: control target
= control target key end

     0   :  { %8 = vsyncpa [#allocation3], 0  ;;  %s655_s0 = inlined_call_operand.vmem [shape: f32[8,1], index: 0, kind: input, shape index: {}]   ;;  %s656_s1 = inlined_call_operand.vmem [shape: f32[8,1], index: 1, kind: input, shape index: {}]   ;;  %s657_s2 = inlined_call_operand.vmem [shape: f32[8,256], index: 2, kind: input, shape index: {}]   ;;  %s658_s3 = inlined_call_operand.hbm [shape: f32[8,256], index: 3, kind: output, shape index: {}]  }
   0x1   :  { %10 = vsyncpa [#allocation3 + $0x1], 0  ;;  %s537_s12 = smov 0   ;;  %s539_s13 = smov 0  }
   0x2   :  { %s541_s14 = smov 0   ;;  %s543_s15 = smov 0  }
   0x3   :  { %s545_s16 = smov 0   ;;  %s547_s17 = smov 0  }
   0x4 LB: > { %s365_s18 = sadd.s32 4294967295, %s513_s17   ;;  %s366_s19 = sadd.s32 4294967294, %s513_s17   ;;  %s513_s17 = sphi %s547_s17, %s16_s17   ;;  %s509_s16 = sphi %s545_s16, %s665_s16   ;;  %s505_s15 = sphi %s543_s15, %s664_s15   ;;  %s501_s14 = sphi %s541_s14, %s663_s14   ;;  %s497_s13 = sphi %s539_s13, %s662_s13   ;;  %s493_s12 = sphi %s537_s12, %s661_s12  }
   0x5   : > { %s25_s20 = sadd.s32 1, %s509_s16  ;;  %s117_s21 = sadd.s32 1, %s501_s14 }
   0x6   : > { %p26_p0 = scmp.ge.s32.totalorder %s25_s20, 2  ;;  %p127_p1 = scmp.ne.s32.totalorder %s501_s14, %s497_s13 }
   0x7   : > { %p128_p2 = scmp.eq.s32.totalorder %s365_s18, 1  ;;  %p133_p3 = scmp.ne.s32.totalorder %s497_s13, %s493_s12 }
   0x8   : > { %s667_s20 = smov (%p26_p0, %s25_s20), 0  ;;  %p134_p5 = scmp.eq.s32.totalorder %s366_s19, 1 }
   0x9   : > { %p577_p4 = por %p128_p2, %p127_p1  ;;  %s113_s23 = ssub.s32 %s509_s16, %s667_s20 }
   0xa   : > { %p371_p6 = scmp.ge.s32.totalorder %s513_s17, 1  ;;  %p115_p7 = scmp.eq.s32.totalorder %s113_s23, 0 }
   0xb   : > { %p584_p8 = por %p134_p5, %p133_p3  ;;  %p177_p9 = scmp.lt.s32.totalorder %s513_s17, 3 }
   0xc   : > { %s590_s25 = scalar_select %p115_p7, %s501_s14, %s117_s21  }
   0xd   : > { %p178_p10 = pnand %p371_p6, %p177_p9 }
   0xe   : > { %v229_v0 = vld [vmem:[%s655_s0] sm:$0xff] (!%p178_p10)  ;;  %v515_v1 = vmov (!%p178_p10), 0   ;;  %p222_p11 = scmp.lt.s32.totalorder (!%p178_p10), %s505_s15, 1  ;;  %s209_s4 = sand.u32 (!%p178_p10), 1, %s497_s13  }
   0xf   : > { %181 = sbr.rel (%p178_p10) target bundleno = 164 (0xa4), region = 32  ;;  %434 = vset.pattern.permute.xlu0 (!%p178_p10), %v515_v1  ;;  %v236_v2 = vld [vmem:[%s656_s1] sm:$0xff] (!%p178_p10)  ;;  %s372_s6 = sshll.u32 (!%p178_p10), %s209_s4, 3 }
  0x10   : > { %232 = vperm.xlu0 (!%p178_p10), %434, %v229_v0   ;;  %s375_s10 = sshll.u32 (!%p178_p10), %s505_s15, 7  ;;  %s211_s11 = scalar_lea.vmem (!%p178_p10), [#allocation2], %s372_s6 }
  0x11   : > { %s260_s18 = sshll.u32 (!%p178_p10), %s211_s11, 4  ;;  %s608_s23 = scalar_lea.hbm (!%p178_p10), %s658_s3, %s375_s10  ;;  %s610_s18 = int_to_ptr.vmem [resolvable:$true] %s260_s18 }
  0x12   : > { %s245_s26 = scalar_lea.sflag (!%p178_p10), [#allocation3], %s209_s4  ;;  %s435_s27 = scalar_lea.vmem (!%p178_p10), %s610_s18, 128 }
  0x13   : > { %p436_p12 = scmp.ne.s32.totalorder (!%p178_p10), %s610_s18, %s435_s27 }
  0x14   : > { %239 = vperm.xlu0 (!%p178_p10), %434, %v236_v2  }
  0x15   : > { %p437_p13 = pnand (!%p178_p10), %p436_p12, %p577_p4 }
  0x16   : > { %s223_s30 = scalar_select %p222_p11, %s505_s15, 1 }
  0x17   : > { %p438_p0 = pneg %p437_p13  ;;  %s516_s15 = smov [#allocation2]  }
  0x18   : > { %s373_s5 = sshll.u32 %s223_s30, 3  ;;  %s439_s28 = sshll.u32 %s516_s15, 4  ;;  %s440_s28 = int_to_ptr.vmem [resolvable:$false] %s439_s28 }
  0x19   : > { %s227_s9 = scalar_lea.vmem %s657_s2, %s373_s5  ;;  %s441_s29 = scalar_lea.vmem %s440_s28, 256 }
  0x1a   : > { %v228_v4 = vld [vmem:[%s227_s9] sm:$0xff]  ;;  %p442_p1 = scmp.lt.s32.totalorder %s610_s18, %s440_s28  ;;  %p443_p2 = scmp.lt.s32.totalorder %s441_s29, %s435_s27 }
  0x1c   : > { %p444_p3 = por %p443_p2, %p442_p1 }
  0x1e   : > { %p445_p5 = pnand %p444_p3, %p438_p0 }
  0x8f   : > { %v233_v3 = vpop.permute.xlu0 %232 }
  0x90   : > { %v235_v5 = vmul.f32 %v233_v3, %v228_v4 }
  0x93   : > { %v240_v6 = vpop.permute.xlu0 %239 }
  0x94   : > { %v242_v7 = vadd.f32 %v240_v6, %v235_v5 }
  0x96   : > { %243 = vst [vmem:[%s211_s11] sm:$0xff] %v242_v7 }
  0x97   : > { %448 = shalt.err (!%p445_p5)
}
  0x98   : > { %s449_s30 = scalar_lea.hbm %s608_s23, 128  ;;  %s453_s6 = scalar_lea.hbm %s658_s3, 256 }
  0x99   : > { %p450_p6 = scmp.ne.s32.totalorder %s608_s23, %s449_s30  ;;  %p454_p10 = scmp.lt.u32.totalorder %s608_s23, %s658_s3 }
  0x9a   : > { %p455_p11 = scmp.lt.u32.totalorder %s453_s6, %s449_s30  ;;  %p457_p13 = scmp.lt.u32.totalorder %s449_s30, %s608_s23 }
  0x9b   : > { %p451_p7 = pnand %p450_p6, %p577_p4 }
  0x9c   : > { %p456_p12 = por %p455_p11, %p454_p10 }
  0x9d   : > { %p452_p9 = pneg %p451_p7 }
  0x9e   : > { %p458_p0 = por %p457_p13, %p456_p12 }
  0xa0   : > { %p459_p1 = pnand %p458_p0, %p452_p9 }
  0xa2   : > { %462 = shalt.err (!%p459_p1)
}
  0xa3   : > { %378 = dma.vmem_to_hbm [thread:$0]  (%p577_p4), %s610_s18, 128, %s608_s23, %s245_s26  }
  0xa4 PF: > { %p384_p2 = scmp.ge.s32.totalorder %s513_s17, 2  ;;  %s272_s9 = sand.u32 1, %s493_s12  }
  0xa5   : > { %s273_s10 = scalar_lea.sflag [#allocation3], %s272_s9 }
  0xa6   : > { %p381_p3 = pnand %p384_p2, %p584_p8 }
  0xa8   : > { %488 = dma.done.wait (!%p381_p3), %s273_s10, 128  }
  0xa9   : > { %490 = vsyncadd (!%p381_p3), %s273_s10, 4294967168  ;;  %s16_s17 = sadd.s32 1, %s513_s17   ;;  %s661_s12 = smov %s497_s13 }
  0xaa   : > { %p13_p5 = scmp.ge.s32.totalorder %s16_s17, 4   ;;  %s662_s13 = smov %s501_s14 }
  0xab   : > { %s663_s14 = smov %s590_s25  ;;  %s664_s15 = smov %s509_s16 }
  0xac   : > { %s665_s16 = smov %s667_s20  ;;  %15 = sbr.rel (!%p13_p5) target bundleno = 4 (0x4), region = 73 }
  0xb3   :  { %278 = vsyncpa [#allocation3], 1 }
  0xb4   :  { %280 = vsyncpa [#allocation3 + $0x1], 1 }

</bundles_post_ra>
